<compile_context>
chip_gen: v5e
topology: v5e:2x2
jax: 0.10.0
libtpu: 0.0.40
codegen_flags: <defaults>
</compile_context>

<pallas_src>
import functools

import jax
import jax.numpy as jnp
from jax.experimental import pallas as pl
from jax.experimental.pallas import tpu as pltpu

LANE = 128


def _round_up(x, m):
    return (x + m - 1) // m * m


def _cdiv(a, b):
    return (a + b - 1) // b


def gru_fc_kernel(x_ref, h_ref, wih_ref, whh_ref, wfc_ref, bfc_ref,
                  out_ref, hnew_ref):
    # x_ref:   (TB, D)       f32        h_ref / hnew_ref: (1, TB, hp) f32
    # wih_ref: (D, 3*hp)     bf16       whh_ref:          (hp, 3*hp)  bf16
    # wfc_ref: (hp, o_pad)   bf16       bfc_ref:          (1, o_pad)  f32
    # out_ref: (TB, o_pad)   f32
    hp = hnew_ref.shape[2]

    x = x_ref[...].astype(jnp.bfloat16)
    h = h_ref[0]                                   # (TB, hp) f32
    hb = h.astype(jnp.bfloat16)

    # One wide MXU matmul per operand (N = 3*hp), f32 accumulation.  The gate slices
    # below land on 128-lane vreg boundaries, so they are free of cross-lane shuffles.
    gi = jnp.dot(x, wih_ref[...], preferred_element_type=jnp.float32)    # (TB, 3*hp)
    gh = jnp.dot(hb, whh_ref[...], preferred_element_type=jnp.float32)   # (TB, 3*hp)

    i_r, i_z, i_n = gi[:, :hp], gi[:, hp:2 * hp], gi[:, 2 * hp:]
    h_r, h_z, h_n = gh[:, :hp], gh[:, hp:2 * hp], gh[:, 2 * hp:]

    def _sigmoid(v):
        # sigmoid(x) == 0.5*tanh(0.5*x) + 0.5 : EUP tanh + cheap VPU ops, no divide.
        return 0.5 * jnp.tanh(0.5 * v) + 0.5

    # Elementwise gate math kept in f32 (EUP tanh, VPU blends).
    r = _sigmoid(i_r + h_r)
    z = _sigmoid(i_z + h_z)
    n = jnp.tanh(i_n + r * h_n)
    h_new = n + z * (h - n)                        # == (1 - z) * n + z * h

    hnew_ref[0] = h_new.astype(hnew_ref.dtype)
    out_ref[...] = (jnp.dot(h_new.astype(jnp.bfloat16), wfc_ref[...],
                            preferred_element_type=jnp.float32)
                    + bfc_ref[...]).astype(out_ref.dtype)


@functools.partial(jax.jit, static_argnames=("hidden_dim", "output_dim", "block_b"))
def rnn_classifier_forward(days, h0, params, *, hidden_dim, output_dim, block_b=512):
    """days: (B, D) f32, h0: (1, B, H) f32 -> (out (B, O) f32, hidden (1, B, H) f32)."""
    w_ih, w_hh, w_fc, b_fc = params
    B, D = days.shape
    hp = w_hh.shape[0]                 # lane-padded hidden slab (multiple of 128)
    o_pad = w_fc.shape[-1]             # lane-padded fc output slab

    # Batch tiling: at least 2 grid programs whenever B allows it, so
    # dimension_semantics=("parallel",) actually puts work on v7x's second TensorCore.
    # Tiles are multiples of 8 sublanes; non-multiple batches get zero-padded.
    if B < 16:
        tb, b_pad = B, B               # single full-batch block (exempt from 8-multiple rule)
    else:
        tb = min(block_b, _round_up(_cdiv(B, 2), 8))
        b_pad = _round_up(B, tb)

    # Lane-dense hidden carry: (1, b_pad, hp).  h0_pad is a fresh array built here, so
    # aliasing it to the hidden output below never donates a caller-visible buffer.
    h0_pad = (jnp.zeros((1, b_pad, hp), jnp.float32)
              .at[:, :B, :hidden_dim].set(h0.astype(jnp.float32)))
    days_in = days if b_pad == B else jnp.zeros((b_pad, D), days.dtype).at[:B].set(days)

    grid = (b_pad // tb,)

    def resident(shape):
        # Full-array block with a constant index_map: DMA'd once, stays in VMEM across
        # the grid.  Buffered(1) drops the pointless second buffer for these weights.
        return pl.BlockSpec(shape, lambda i: (0,) * len(shape),
                            pipeline_mode=pl.Buffered(1))

    out_padded, hidden_pad = pl.pallas_call(
        gru_fc_kernel,
        grid=grid,
        in_specs=[
            pl.BlockSpec((tb, D), lambda i: (i, 0)),          # days (batch-tiled)
            pl.BlockSpec((1, tb, hp), lambda i: (0, i, 0)),   # h0   (batch-tiled)
            resident((D, 3 * hp)),                            # W_ih (resident)
            resident((hp, 3 * hp)),                           # W_hh (resident)
            resident((hp, o_pad)),                            # W_fc (resident)
            resident((1, o_pad)),                             # b_fc (resident)
        ],
        out_specs=(
            pl.BlockSpec((tb, o_pad), lambda i: (i, 0)),      # logits (lane-dense, padded)
            pl.BlockSpec((1, tb, hp), lambda i: (0, i, 0)),   # hidden (lane-dense, padded)
        ),
        out_shape=(
            jax.ShapeDtypeStruct((b_pad, o_pad), jnp.float32),
            jax.ShapeDtypeStruct((1, b_pad, hp), jnp.float32),
        ),
        input_output_aliases={1: 1},   # reuse the (internal) h0_pad buffer for hidden
        compiler_params=pltpu.CompilerParams(
            dimension_semantics=("parallel",),   # v7x: shard batch over 2 TCs
            vmem_limit_bytes=48 * 1024 * 1024,   # > 16/32 MiB scoped defaults,
        ),                                       # < v7x's 64 MiB physical VMEM
    )(days_in, h0_pad, w_ih, w_hh, w_fc, b_fc)

    return out_padded[:B, :output_dim], hidden_pad[:, :B, :hidden_dim]


def pack_params(pt_params, input_dim, hidden_dim, output_dim):
    """Re-lay out PyTorch-layout weights for the kernel:
      * hidden dim zero-padded to a full 128-lane slab (hp);
      * gate-concatenated, pre-transposed matmul weights: W_ih -> (D, 3*hp),
        W_hh -> (hp, 3*hp), each gate in its own 128-lane-aligned slab;
      * fc weight (hp, o_pad) / bias (1, o_pad) zero-padded for an unmasked output store;
      * matmul weights stored bf16 (MXU operands), bias kept f32."""
    w_ih_pt, w_hh_pt, w_fc_pt, b_fc_pt = pt_params
    hp = _round_up(max(hidden_dim, LANE), LANE)
    o_pad = _round_up(max(output_dim, LANE), LANE)

    def gate_slabs(w_pt, in_dim, in_pad):
        # (3*H, in_dim) torch layout -> (in_pad, 3*hp), gate g in cols [g*hp, (g+1)*hp)
        w = jnp.transpose(w_pt.reshape(3, hidden_dim, in_dim), (0, 2, 1))    # (3, in_dim, H)
        w = jnp.zeros((3, in_pad, hp), jnp.float32).at[:, :in_dim, :hidden_dim].set(w)
        return jnp.concatenate([w[0], w[1], w[2]], axis=-1).astype(jnp.bfloat16)

    w_ih = gate_slabs(w_ih_pt, input_dim, input_dim)      # (D, 3*hp)
    w_hh = gate_slabs(w_hh_pt, hidden_dim, hp)            # (hp, 3*hp)
    w_fc = (jnp.zeros((hp, o_pad), jnp.float32)
            .at[:hidden_dim, :output_dim].set(w_fc_pt.T).astype(jnp.bfloat16))
    b_fc = jnp.zeros((1, o_pad), jnp.float32).at[0, :output_dim].set(b_fc_pt)
    return (w_ih, w_hh, w_fc, b_fc)


def init_params(key, input_dim, hidden_dim, output_dim):
    """Match nn.GRU(input_dim, hidden_dim, bias=False) + nn.Linear(hidden_dim, output_dim).
    Returns (kernel_params, pt_params); pt_params keep the PyTorch storage layout and are
    used by the pure-JAX reference."""
    k1, k2, k3, k4 = jax.random.split(key, 4)
    scale = 1.0 / jnp.sqrt(hidden_dim)
    # PyTorch storage: weight_ih_l0 (3H, D), weight_hh_l0 (3H, H), fc.weight (O, H), fc.bias (O,)
    w_ih_pt = jax.random.uniform(k1, (3 * hidden_dim, input_dim), jnp.float32, -scale, scale)
    w_hh_pt = jax.random.uniform(k2, (3 * hidden_dim, hidden_dim), jnp.float32, -scale, scale)
    w_fc_pt = jax.random.uniform(k3, (output_dim, hidden_dim), jnp.float32, -scale, scale)
    b_fc_pt = jax.random.uniform(k4, (output_dim,), jnp.float32, -scale, scale)
    pt_params = (w_ih_pt, w_hh_pt, w_fc_pt, b_fc_pt)
    return pack_params(pt_params, input_dim, hidden_dim, output_dim), pt_params


def ref_forward(days, h, pt_params):
    """Pure-JAX reference in the PyTorch storage layout (gate order r, z, n; no GRU
    biases), with the same bf16-operand / f32-accumulate matmul dtypes as the kernel."""
    w_ih_pt, w_hh_pt, w_fc_pt, b_fc_pt = pt_params
    xb = days.astype(jnp.bfloat16)
    hb = h.astype(jnp.bfloat16)
    gi = jnp.dot(xb, w_ih_pt.T.astype(jnp.bfloat16), preferred_element_type=jnp.float32)
    gh = jnp.dot(hb, w_hh_pt.T.astype(jnp.bfloat16), preferred_element_type=jnp.float32)
    i_r, i_z, i_n = jnp.split(gi, 3, axis=-1)
    h_r, h_z, h_n = jnp.split(gh, 3, axis=-1)
    r = jax.nn.sigmoid(i_r + h_r)
    z = jax.nn.sigmoid(i_z + h_z)
    n = jnp.tanh(i_n + r * h_n)
    h_new = (1.0 - z) * n + z * h
    out = jnp.dot(h_new.astype(jnp.bfloat16), w_fc_pt.T.astype(jnp.bfloat16),
                  preferred_element_type=jnp.float32) + b_fc_pt
    return out, h_new


if __name__ == "__main__":
    input_dim, hidden_dim, output_dim = 16, 32, 4

    key = jax.random.PRNGKey(0)
    kp, kx1, kx2 = jax.random.split(key, 3)
    params, pt_params = init_params(kp, input_dim, hidden_dim, output_dim)

    # Case 1: tiny batch (single grid program, full-batch block).
    batch = 2
    days = jax.random.normal(kx1, (batch, input_dim), jnp.float32)
    h0 = jnp.zeros((1, batch, hidden_dim), jnp.float32)           # = initHidden(batch)
    out, hidden = rnn_classifier_forward(days, h0, params,
                                         hidden_dim=hidden_dim, output_dim=output_dim)
    jax.block_until_ready((out, hidden))
    out_ref, h_ref = ref_forward(days, h0[0], pt_params)
    assert out.shape == (batch, output_dim)
    assert hidden.shape == (1, batch, hidden_dim)
    assert jnp.allclose(out, out_ref, atol=1e-3, rtol=1e-3), \
        float(jnp.max(jnp.abs(out - out_ref)))
    assert jnp.allclose(hidden[0], h_ref, atol=1e-3, rtol=1e-3), \
        float(jnp.max(jnp.abs(hidden[0] - h_ref)))

    # Case 2: batch large enough to split into >= 2 grid programs (v7x megacore path),
    # with a non-tile-multiple size to exercise the batch-padding path.
    batch2 = 40
    days2 = jax.random.normal(kx2, (batch2, input_dim), jnp.float32)
    h02 = jnp.zeros((1, batch2, hidden_dim), jnp.float32)
    out2, hidden2 = rnn_classifier_forward(days2, h02, params,
                                           hidden_dim=hidden_dim, output_dim=output_dim)
    jax.block_until_ready((out2, hidden2))
    out2_ref, h2_ref = ref_forward(days2, h02[0], pt_params)
    assert out2.shape == (batch2, output_dim)
    assert hidden2.shape == (1, batch2, hidden_dim)
    assert jnp.allclose(out2, out2_ref, atol=1e-3, rtol=1e-3), \
        float(jnp.max(jnp.abs(out2 - out2_ref)))
    assert jnp.allclose(hidden2[0], h2_ref, atol=1e-3, rtol=1e-3), \
        float(jnp.max(jnp.abs(hidden2[0] - h2_ref)))

    print("KERNEL_OK")
</pallas_src>

<mosaic_0001>
module attributes {stable_mosaic.version = 11 : i64} {
  func.func @gru_fc_kernel(%arg0: i32, %arg1: memref<2x16xf32, #tpu.memory_space<vmem>>, %arg2: memref<1x2x128xf32, #tpu.memory_space<vmem>>, %arg3: memref<16x384xbf16, #tpu.memory_space<vmem>>, %arg4: memref<128x384xbf16, #tpu.memory_space<vmem>>, %arg5: memref<128x128xbf16, #tpu.memory_space<vmem>>, %arg6: memref<1x128xf32, #tpu.memory_space<vmem>>, %arg7: memref<2x128xf32, #tpu.memory_space<vmem>>, %arg8: memref<1x2x128xf32, #tpu.memory_space<vmem>>) attributes {dimension_semantics = [#tpu.dimension_semantics<parallel>], iteration_bounds = array<i64: 1>, scalar_prefetch = 0 : i64, scratch_operands = 0 : i64, tpu.core_type = #tpu.core_type<tc>, window_params = [{transform_indices = @transform_0, window_bounds = array<i64: 2, 16>}, {transform_indices = @transform_1, window_bounds = array<i64: 1, 2, 128>}, {pipeline_mode = #tpu.pipeline_mode<synchronous>, transform_indices = @transform_2, window_bounds = array<i64: 16, 384>}, {pipeline_mode = #tpu.pipeline_mode<synchronous>, transform_indices = @transform_3, window_bounds = array<i64: 128, 384>}, {pipeline_mode = #tpu.pipeline_mode<synchronous>, transform_indices = @transform_4, window_bounds = array<i64: 128, 128>}, {pipeline_mode = #tpu.pipeline_mode<synchronous>, transform_indices = @transform_5, window_bounds = array<i64: 1, 128>}, {transform_indices = @transform_6, window_bounds = array<i64: 2, 128>}, {transform_indices = @transform_7, window_bounds = array<i64: 1, 2, 128>}]} {
    %c0 = arith.constant 0 : index
    %c0_0 = arith.constant 0 : index
    %0 = vector.load %arg1[%c0, %c0_0] : memref<2x16xf32, #tpu.memory_space<vmem>>, vector<2x16xf32>
    %1 = arith.truncf %0 : vector<2x16xf32> to vector<2x16xbf16>
    %c0_1 = arith.constant 0 : index
    %c0_2 = arith.constant 0 : index
    %c0_3 = arith.constant 0 : index
    %2 = vector.load %arg2[%c0_1, %c0_2, %c0_3] : memref<1x2x128xf32, #tpu.memory_space<vmem>>, vector<1x2x128xf32>
    %3 = vector.shape_cast %2 : vector<1x2x128xf32> to vector<2x128xf32>
    %4 = arith.truncf %3 : vector<2x128xf32> to vector<2x128xbf16>
    %c0_4 = arith.constant 0 : index
    %c0_5 = arith.constant 0 : index
    %5 = vector.load %arg3[%c0_4, %c0_5] : memref<16x384xbf16, #tpu.memory_space<vmem>>, vector<16x384xbf16>
    %cst = arith.constant dense<0.000000e+00> : vector<2x384xf32>
    %6 = tpu.matmul %1, %5, %cst {dimension_numbers = #tpu.dot_dimension_numbers<[1], [0], [0], [1], [0, 0, 1, 1], [], []>} : vector<2x16xbf16>, vector<16x384xbf16>, vector<2x384xf32> -> vector<2x384xf32>
    %c0_6 = arith.constant 0 : index
    %c0_7 = arith.constant 0 : index
    %7 = vector.load %arg4[%c0_6, %c0_7] : memref<128x384xbf16, #tpu.memory_space<vmem>>, vector<128x384xbf16>
    %cst_8 = arith.constant dense<0.000000e+00> : vector<2x384xf32>
    %8 = tpu.matmul %4, %7, %cst_8 {dimension_numbers = #tpu.dot_dimension_numbers<[1], [0], [0], [1], [0, 0, 1, 1], [], []>} : vector<2x128xbf16>, vector<128x384xbf16>, vector<2x384xf32> -> vector<2x384xf32>
    %9 = vector.extract_strided_slice %6 {offsets = [0, 0], sizes = [2, 128], strides = [1, 1]} : vector<2x384xf32> to vector<2x128xf32>
    %10 = vector.extract_strided_slice %6 {offsets = [0, 128], sizes = [2, 128], strides = [1, 1]} : vector<2x384xf32> to vector<2x128xf32>
    %11 = vector.extract_strided_slice %6 {offsets = [0, 256], sizes = [2, 128], strides = [1, 1]} : vector<2x384xf32> to vector<2x128xf32>
    %12 = vector.extract_strided_slice %8 {offsets = [0, 0], sizes = [2, 128], strides = [1, 1]} : vector<2x384xf32> to vector<2x128xf32>
    %13 = vector.extract_strided_slice %8 {offsets = [0, 128], sizes = [2, 128], strides = [1, 1]} : vector<2x384xf32> to vector<2x128xf32>
    %14 = vector.extract_strided_slice %8 {offsets = [0, 256], sizes = [2, 128], strides = [1, 1]} : vector<2x384xf32> to vector<2x128xf32>
    %15 = arith.addf %9, %12 : vector<2x128xf32>
    %cst_9 = arith.constant 5.000000e-01 : f32
    %16 = vector.broadcast %cst_9 : f32 to vector<2x128xf32>
    %17 = arith.mulf %16, %15 : vector<2x128xf32>
    %18 = math.tanh %17 : vector<2x128xf32>
    %cst_10 = arith.constant 5.000000e-01 : f32
    %19 = vector.broadcast %cst_10 : f32 to vector<2x128xf32>
    %20 = arith.mulf %19, %18 : vector<2x128xf32>
    %cst_11 = arith.constant 5.000000e-01 : f32
    %21 = vector.broadcast %cst_11 : f32 to vector<2x128xf32>
    %22 = arith.addf %20, %21 : vector<2x128xf32>
    %23 = arith.addf %10, %13 : vector<2x128xf32>
    %cst_12 = arith.constant 5.000000e-01 : f32
    %24 = vector.broadcast %cst_12 : f32 to vector<2x128xf32>
    %25 = arith.mulf %24, %23 : vector<2x128xf32>
    %26 = math.tanh %25 : vector<2x128xf32>
    %cst_13 = arith.constant 5.000000e-01 : f32
    %27 = vector.broadcast %cst_13 : f32 to vector<2x128xf32>
    %28 = arith.mulf %27, %26 : vector<2x128xf32>
    %cst_14 = arith.constant 5.000000e-01 : f32
    %29 = vector.broadcast %cst_14 : f32 to vector<2x128xf32>
    %30 = arith.addf %28, %29 : vector<2x128xf32>
    %31 = arith.mulf %22, %14 : vector<2x128xf32>
    %32 = arith.addf %11, %31 : vector<2x128xf32>
    %33 = math.tanh %32 : vector<2x128xf32>
    %34 = arith.subf %3, %33 : vector<2x128xf32>
    %35 = arith.mulf %30, %34 : vector<2x128xf32>
    %36 = arith.addf %33, %35 : vector<2x128xf32>
    %c0_15 = arith.constant 0 : index
    %c0_16 = arith.constant 0 : index
    %c0_17 = arith.constant 0 : index
    %37 = vector.load %arg8[%c0_15, %c0_16, %c0_17] : memref<1x2x128xf32, #tpu.memory_space<vmem>>, vector<1x2x128xf32>
    %38 = vector.shape_cast %37 : vector<1x2x128xf32> to vector<2x128xf32>
    %39 = vector.shape_cast %36 : vector<2x128xf32> to vector<1x2x128xf32>
    tpu.vector_store %arg8[%c0_15, %c0_16, %c0_17], %39 {strides = array<i32>} : memref<1x2x128xf32, #tpu.memory_space<vmem>>, vector<1x2x128xf32>,
    %40 = arith.truncf %36 : vector<2x128xf32> to vector<2x128xbf16>
    %c0_18 = arith.constant 0 : index
    %c0_19 = arith.constant 0 : index
    %41 = vector.load %arg5[%c0_18, %c0_19] : memref<128x128xbf16, #tpu.memory_space<vmem>>, vector<128x128xbf16>
    %cst_20 = arith.constant dense<0.000000e+00> : vector<2x128xf32>
    %42 = tpu.matmul %40, %41, %cst_20 {dimension_numbers = #tpu.dot_dimension_numbers<[1], [0], [0], [1], [0, 0, 1, 1], [], []>} : vector<2x128xbf16>, vector<128x128xbf16>, vector<2x128xf32> -> vector<2x128xf32>
    %c0_21 = arith.constant 0 : index
    %c0_22 = arith.constant 0 : index
    %43 = vector.load %arg6[%c0_21, %c0_22] : memref<1x128xf32, #tpu.memory_space<vmem>>, vector<1x128xf32>
    %44 = vector.broadcast %43 : vector<1x128xf32> to vector<2x128xf32>
    %45 = arith.addf %42, %44 : vector<2x128xf32>
    %c0_23 = arith.constant 0 : index
    %c0_24 = arith.constant 0 : index
    %46 = vector.load %arg7[%c0_23, %c0_24] : memref<2x128xf32, #tpu.memory_space<vmem>>, vector<2x128xf32>
    tpu.vector_store %arg7[%c0_23, %c0_24], %45 {strides = array<i32>} : memref<2x128xf32, #tpu.memory_space<vmem>>, vector<2x128xf32>,
    return
  }
  func.func @transform_0(%arg0: i32) -> (i32, i32) {
    %c0_i32 = arith.constant 0 : i32
    %c0_i32_0 = arith.constant 0 : i32
    return %arg0, %c0_i32 : i32, i32
  }
  func.func @transform_1(%arg0: i32) -> (i32, i32, i32) {
    %c0_i32 = arith.constant 0 : i32
    %c0_i32_0 = arith.constant 0 : i32
    %c0_i32_1 = arith.constant 0 : i32
    return %c0_i32, %arg0, %c0_i32_0 : i32, i32, i32
  }
  func.func @transform_2(%arg0: i32) -> (i32, i32) {
    %c0_i32 = arith.constant 0 : i32
    %c0_i32_0 = arith.constant 0 : i32
    %c0_i32_1 = arith.constant 0 : i32
    return %c0_i32, %c0_i32_0 : i32, i32
  }
  func.func @transform_3(%arg0: i32) -> (i32, i32) {
    %c0_i32 = arith.constant 0 : i32
    %c0_i32_0 = arith.constant 0 : i32
    %c0_i32_1 = arith.constant 0 : i32
    return %c0_i32, %c0_i32_0 : i32, i32
  }
  func.func @transform_4(%arg0: i32) -> (i32, i32) {
    %c0_i32 = arith.constant 0 : i32
    %c0_i32_0 = arith.constant 0 : i32
    %c0_i32_1 = arith.constant 0 : i32
    return %c0_i32, %c0_i32_0 : i32, i32
  }
  func.func @transform_5(%arg0: i32) -> (i32, i32) {
    %c0_i32 = arith.constant 0 : i32
    %c0_i32_0 = arith.constant 0 : i32
    %c0_i32_1 = arith.constant 0 : i32
    return %c0_i32, %c0_i32_0 : i32, i32
  }
  func.func @transform_6(%arg0: i32) -> (i32, i32) {
    %c0_i32 = arith.constant 0 : i32
    %c0_i32_0 = arith.constant 0 : i32
    return %arg0, %c0_i32 : i32, i32
  }
  func.func @transform_7(%arg0: i32) -> (i32, i32, i32) {
    %c0_i32 = arith.constant 0 : i32
    %c0_i32_0 = arith.constant 0 : i32
    %c0_i32_1 = arith.constant 0 : i32
    return %c0_i32, %arg0, %c0_i32_0 : i32, i32, i32
  }
}

</mosaic_0001>

<bundles_post_ra>
// kernel: rnn_classifier_forward.1
= control target key start
LH: loop header
LB: loop body
LE: loop exit
PB: predicated region body
PF: predicated region fallthrough
CT: control target
= control target key end

     0   :  { %13 = vsyncpa [#allocation3], 0  ;;  %s832_s0 = inlined_call_operand.vmem [shape: f32[2,16], index: 0, kind: input, shape index: {}]   ;;  %s833_s1 = inlined_call_operand.vmem [shape: f32[1,2,128], index: 1, kind: input, shape index: {}, may-alias: {1,7}]   ;;  %s834_s2 = inlined_call_operand.hbm [shape: bf16[16,384], index: 2, kind: input, shape index: {}]   ;;  %s835_s3 = inlined_call_operand.hbm [shape: bf16[128,384], index: 3, kind: input, shape index: {}]   ;;  %s836_s4 = inlined_call_operand.hbm [shape: bf16[128,128], index: 4, kind: input, shape index: {}]   ;;  %s837_s5 = inlined_call_operand.vmem [shape: f32[1,128], index: 5, kind: input, shape index: {}]   ;;  %s838_s6 = inlined_call_operand.hbm [shape: f32[2,128], index: 6, kind: output, shape index: {0}]   ;;  %s839_s7 = inlined_call_operand.vmem [shape: f32[1,2,128], index: 7, kind: output, shape index: {1}, may-alias: {1,7}]  }
   0x1   :  { %14 = vsyncpa [#allocation6], 0 }
   0x2   :  { %15 = vsyncpa [#allocation4], 0  ;;  %s37_s26 = sshll.u32 %s835_s3, 4  ;;  %s757_s27 = smov [#allocation5]   ;;  %s38_s26 = int_to_ptr.hbm [resolvable:$true] %s37_s26 }
   0x3   :  { %s39_s28 = sshll.u32 %s757_s27, 4  ;;  %s24_s8 = sshll.u32 %s834_s2, 4  ;;  %s40_s28 = int_to_ptr.vmem [resolvable:$true] %s39_s28  ;;  %s25_s8 = int_to_ptr.hbm [resolvable:$true] %s24_s8 }
   0x4   :  { %s758_s9 = smov 192   ;;  %s759_s10 = smov 12  }
   0x5   :  { %45 = dma.hbm_to_vmem [thread:$0]  %s38_s26, 3072, %s40_s28, [#allocation6], %s758_s9, %s758_s9, %s759_s10  }
   0x6   :  { %s760_s11 = smov [#allocation2]   ;;  %s50_s15 = sshll.u32 %s836_s4, 4  ;;  %s51_s15 = int_to_ptr.hbm [resolvable:$true] %s50_s15 }
   0x7   :  { %s26_s12 = sshll.u32 %s760_s11, 4  ;;  %s761_s3 = smov [#allocation7]   ;;  %s27_s12 = int_to_ptr.vmem [resolvable:$true] %s26_s12 }
   0x8   :  { %32 = dma.hbm_to_vmem [thread:$0]  %s25_s8, 384, %s27_s12, [#allocation3], %s758_s9, %s758_s9, %s759_s10  }
   0x9   :  { %s52_s16 = sshll.u32 %s761_s3, 4  ;;  %s762_s17 = smov 64   ;;  %s53_s16 = int_to_ptr.vmem [resolvable:$true] %s52_s16 }
   0xa   :  { %s763_s18 = smov 4  }
   0xb   :  { %58 = dma.hbm_to_vmem [thread:$0]  %s51_s15, 1024, %s53_s16, [#allocation6], %s762_s17, %s762_s17, %s763_s18  }
   0xc   :  { %751 = dma.done.wait [#allocation3], 384  }
   0xd   :  { %752 = vsyncadd [#allocation3], 4294966912 }
   0xe   :  { %753 = dma.done.wait [#allocation6], 4096  }
   0xf   :  { %754 = vsyncadd [#allocation6], 4294963200  ;;  %v563_v0 = vld [vmem:[#allocation5 + $0xa8] sm:$0xf]  ;;  %v630_v1 = vld [vmem:[#allocation5 + $0xb0] sm:$0xf0] }
  0x10   :  { %v464_v2 = vld [vmem:[#allocation2] sm:$0xf]  ;;  %v564_v3 = vor.u32 %v630_v1, %v563_v0  ;;  %v606_v4 = vld [vmem:[#allocation2 + $0x8] sm:$0xf0]  ;;  %v551_v5 = vld [vmem:[#allocation5 + $0x90] sm:$0xf] }
  0x11   :  { %v627_v6 = vld [vmem:[#allocation5 + $0x98] sm:$0xf0]  ;;  %v465_v7 = vor.u32 %v606_v4, %v464_v2  ;;  %v629_v8 = vld [vmem:[#allocation5 + $0xac] sm:$0xf]  ;;  %v565_v9 = vld [vmem:[#allocation5 + $0xb4] sm:$0xf0] }
  0x12   :  { %301 = vmatpush.bf16.msra.mxu3 %v564_v3  ;;  %v552_v10 = vor.u32 %v627_v6, %v551_v5  ;;  %v568_v11 = vor.u32 %v629_v8, %v565_v9  ;;  %v539_v12 = vld [vmem:[#allocation5 + $0x78] sm:$0xf]  ;;  %v626_v13 = vld [vmem:[#allocation5 + $0x94] sm:$0xf]  ;;  %v553_v14 = vld [vmem:[#allocation5 + $0x9c] sm:$0xf0] }
  0x13   :  { %109 = vmatpush.bf16.msra.mxu0 %v465_v7  ;;  %v624_v15 = vld [vmem:[#allocation5 + $0x80] sm:$0xf0]  ;;  %v605_v16 = vld [vmem:[#allocation2 + $0x4] sm:$0xf]  ;;  %v466_v17 = vld [vmem:[#allocation2 + $0xc] sm:$0xf0]  ;;  %v556_v18 = vor.u32 %v626_v13, %v553_v14 }
  0x14   :  { %v469_v19 = vor.u32 %v605_v16, %v466_v17  ;;  %v623_v20 = vld [vmem:[#allocation5 + $0x7c] sm:$0xf]  ;;  %v541_v21 = vld [vmem:[#allocation5 + $0x84] sm:$0xf0]  ;;  %v571_v22 = vld [vmem:[#allocation5 + $0xb0] sm:$0xf]  ;;  %v540_v24 = vor.u32 %v624_v15, %v539_v12 }
  0x15   :  { %v631_v23 = vld [vmem:[#allocation5 + $0xb8] sm:$0xf0]  ;;  %v527_v25 = vld [vmem:[#allocation5 + $0x60] sm:$0xf]  ;;  %v621_v26 = vld [vmem:[#allocation5 + $0x68] sm:$0xf0]  ;;  %v544_v31 = vor.u32 %v623_v20, %v541_v21 }
  0x16   :  { %302 = vmatpush.bf16.msra.mxu3 %v552_v10  ;;  %122 = vmatpush.bf16.msra.mxu1 %v469_v19  ;;  %v572_v27 = vor.u32 %v631_v23, %v571_v22  ;;  %vm98_vm0 = vcmask 130048   ;;  %v559_v28 = vld [vmem:[#allocation5 + $0x98] sm:$0xf]  ;;  %v628_v29 = vld [vmem:[#allocation5 + $0xa0] sm:$0xf0]  ;;  %v528_v38 = vor.u32 %v621_v26, %v527_v25  ;;  %v637_v25 = vld [vmem:[#allocation7 + $0x28] sm:$0xff] }
  0x17   :  { %314 = vmatpush.bf16.msrb.mxu0 %v568_v11  ;;  %v74_v30 = vld [vmem:[%s832_s0] sm:$0x3]  ;;  %v620_v32 = vld [vmem:[#allocation5 + $0x64] sm:$0xf]  ;;  %v560_v33 = vor.u32 %v628_v29, %v559_v28  ;;  %v529_v35 = vld [vmem:[#allocation5 + $0x6c] sm:$0xf0] }
  0x18   :  { %v75_v34 = vpack.c.bf16 %v74_v30, %v74_v30  ;;  %v547_v36 = vld [vmem:[#allocation5 + $0x80] sm:$0xf]  ;;  %v625_v37 = vld [vmem:[#allocation5 + $0x88] sm:$0xf0]  ;;  %v515_v39 = vld [vmem:[#allocation5 + $0x48] sm:$0xf]  ;;  %v532_v41 = vor.u32 %v620_v32, %v529_v35 }
  0x19   :  { %v618_v40 = vld [vmem:[#allocation5 + $0x50] sm:$0xf0]  ;;  %v617_v42 = vld [vmem:[#allocation5 + $0x4c] sm:$0xf]  ;;  %v548_v43 = vor.u32 %v625_v37, %v547_v36  ;;  %v517_v44 = vld [vmem:[#allocation5 + $0x54] sm:$0xf0] }
  0x1a   :  { %327 = vmatpush.bf16.msrb.mxu1 %v572_v27  ;;  %303 = vmatpush.bf16.msra.mxu3 %v540_v24  ;;  %v535_v45 = vld [vmem:[#allocation5 + $0x68] sm:$0xf]  ;;  %v622_v46 = vld [vmem:[#allocation5 + $0x70] sm:$0xf0]  ;;  %v516_v47 = vor.u32 %v618_v40, %v515_v39  ;;  %v503_v48 = vld [vmem:[#allocation5 + $0x30] sm:$0xf]  ;;  %v520_v51 = vor.u32 %v617_v42, %v517_v44 }
  0x1b   :  { %315 = vmatpush.bf16.msrb.mxu0 %v556_v18  ;;  %475 = vmatmul.msk.bf16.vlgmr.msra.gmra.mxu1 %vm98_vm0, %v75_v34  ;;  %v615_v49 = vld [vmem:[#allocation5 + $0x38] sm:$0xf0]  ;;  %v472_v50 = vld [vmem:[#allocation2 + $0x8] sm:$0xf]  ;;  %v614_v52 = vld [vmem:[#allocation5 + $0x34] sm:$0xf]  ;;  %v536_v54 = vor.u32 %v622_v46, %v535_v45 }
  0x1c   :  { %474 = vmatmul.msk.bf16.vlgmr.msra.gmra.mxu0 %vm98_vm0, %v75_v34  ;;  %v505_v53 = vld [vmem:[#allocation5 + $0x3c] sm:$0xf0]  ;;  %v607_v55 = vld [vmem:[#allocation2 + $0x10] sm:$0xf0]  ;;  %v523_v56 = vld [vmem:[#allocation5 + $0x50] sm:$0xf]  ;;  %v504_v59 = vor.u32 %v615_v49, %v503_v48 }
  0x1d   :  { %v619_v57 = vld [vmem:[#allocation5 + $0x58] sm:$0xf0]  ;;  %v473_v58 = vor.u32 %v607_v55, %v472_v50  ;;  %v491_v60 = vld [vmem:[#allocation5 + $0x18] sm:$0xf]  ;;  %v612_v61 = vld [vmem:[#allocation5 + $0x20] sm:$0xf0]  ;;  %v508_v62 = vor.u32 %v614_v52, %v505_v53 }
  0x1e   :  { %328 = vmatpush.bf16.msrb.mxu1 %v560_v33  ;;  %304 = vmatpush.bf16.msra.mxu3 %v528_v38  ;;  %v611_v63 = vld [vmem:[#allocation5 + $0x1c] sm:$0xf]  ;;  %v524_v0 = vor.u32 %v619_v57, %v523_v56  ;;  %v493_v1 = vld [vmem:[#allocation5 + $0x24] sm:$0xf0]  ;;  %v511_v2 = vld [vmem:[#allocation5 + $0x38] sm:$0xf]  ;;  %v492_v4 = vor.u32 %v612_v61, %v491_v60 }
  0x1f   :  { %316 = vmatpush.bf16.msrb.mxu0 %v544_v31  ;;  %135 = vmatpush.bf16.msra.mxu2 %v473_v58  ;;  %v616_v3 = vld [vmem:[#allocation5 + $0x40] sm:$0xf0]  ;;  %v479_v5 = vld [vmem:[#allocation5] sm:$0xf]  ;;  %v609_v6 = vld [vmem:[#allocation5 + $0x8] sm:$0xf0]  ;;  %v496_v7 = vor.u32 %v611_v63, %v493_v1 }
  0x20   :  { %v608_v8 = vld [vmem:[#allocation5 + $0x4] sm:$0xf]  ;;  %v512_v9 = vor.u32 %v616_v3, %v511_v2  ;;  %v481_v10 = vld [vmem:[#allocation5 + $0xc] sm:$0xf0]  ;;  %v499_v11 = vld [vmem:[#allocation5 + $0x20] sm:$0xf]  ;;  %v480_v13 = vor.u32 %v609_v6, %v479_v5 }
  0x21   :  { %v613_v12 = vld [vmem:[#allocation5 + $0x28] sm:$0xf0]  ;;  %v76_v14 = vld [vmem:[%s833_s1] sm:$0x3]  ;;  %v484_v15 = vor.u32 %v608_v8, %v481_v10  ;;  %v610_v19 = vld [vmem:[#allocation5 + $0x10] sm:$0xf0] }
  0x22   :  { %329 = vmatpush.bf16.msrb.mxu1 %v548_v43  ;;  %305 = vmatpush.bf16.msra.mxu3 %v516_v47  ;;  %v500_v16 = vor.u32 %v613_v12, %v499_v11  ;;  %v77_v17 = vpack.c.bf16 %v76_v14, %v76_v14  ;;  %v487_v18 = vld [vmem:[#allocation5 + $0x8] sm:$0xf]  ;;  %v639_v21 = vld [vmem:[#allocation7 + $0x38] sm:$0xff]  ;;  %v638_v24 = vld [vmem:[#allocation7 + $0x30] sm:$0xff]  ;;  %s764_s23 = smov [#allocation8]   ;;  %s447_s27 = sshll.u32 %s838_s6, 4  ;;  %s448_s27 = int_to_ptr.hbm [resolvable:$true] %s447_s27 }
  0x23   :  { %317 = vmatpush.bf16.msrb.mxu0 %v532_v41  ;;  %476 = vmatmul.msk.bf16.vlgmr.msra.gmra.mxu2 %vm98_vm0, %v75_v34  ;;  %v488_v20 = vor.u32 %v610_v19, %v487_v18  ;;  %v636_v28 = vld [vmem:[#allocation7 + $0x20] sm:$0xff]  ;;  %v635_v29 = vld [vmem:[#allocation7 + $0x18] sm:$0xff]  ;;  %v634_v31 = vld [vmem:[#allocation7 + $0x10] sm:$0xff]  ;;  %s445_s24 = sshll.u32 %s764_s23, 4  ;;  %s446_s24 = int_to_ptr.vmem [resolvable:$true] %s445_s24 }
  0x24   :  { %426 = vmatpush.bf16.msrb.mxu2 %v639_v21  ;;  %v633_v32 = vld [vmem:[#allocation7 + $0x8] sm:$0xff]  ;;  %v632_v34 = vld [vmem:[#allocation7] sm:$0xff] }
  0x25   :  { %v648_v58 = vld [vmem:[%s837_s5] ss:$0 sm:$0xff] }
  0x26   :  { %330 = vmatpush.bf16.msrb.mxu1 %v536_v54  ;;  %306 = vmatpush.bf16.msra.mxu3 %v504_v59 }
  0x27   :  { %318 = vmatpush.bf16.msrb.mxu0 %v520_v51 }
  0x28   :  { %427 = vmatpush.bf16.msrb.mxu2 %v638_v24 }
  0x2a   :  { %331 = vmatpush.bf16.msrb.mxu1 %v524_v0  ;;  %307 = vmatpush.bf16.msra.mxu3 %v492_v4 }
  0x2b   :  { %319 = vmatpush.bf16.msrb.mxu0 %v508_v62 }
  0x2c   :  { %428 = vmatpush.bf16.msrb.mxu2 %v637_v25 }
  0x2e   :  { %332 = vmatpush.bf16.msrb.mxu1 %v512_v9  ;;  %308 = vmatpush.bf16.msra.mxu3 %v480_v13 }
  0x2f   :  { %320 = vmatpush.bf16.msrb.mxu0 %v496_v7 }
  0x30   :  { %429 = vmatpush.bf16.msrb.mxu2 %v636_v28 }
  0x31   :  { %309 = vmatmul.bf16.vlgmr.msra.gmra.mxu3 %v77_v17 }
  0x32   :  { %333 = vmatpush.bf16.msrb.mxu1 %v500_v16 }
  0x33   :  { %321 = vmatpush.bf16.msrb.mxu0 %v484_v15 }
  0x34   :  { %430 = vmatpush.bf16.msrb.mxu2 %v635_v29 }
  0x36   :  { %322 = vmatmul.bf16.vlgmr.msrb.gmra.mxu0 %v77_v17  ;;  %334 = vmatpush.bf16.msrb.mxu1 %v488_v20 }
  0x38   :  { %431 = vmatpush.bf16.msrb.mxu2 %v634_v31 }
  0x39   :  { %335 = vmatmul.bf16.vlgmr.msrb.gmra.mxu1 %v77_v17 }
  0x3c   :  { %432 = vmatpush.bf16.msrb.mxu2 %v633_v32 }
  0x40   :  { %433 = vmatpush.bf16.msrb.mxu2 %v632_v34 }
  0x98   :  { %v124_v23 = vpop.f32.mrf.mxu1 }
  0x99   :  { %v111_v22 = vpop.f32.mrf.mxu0 }
  0xa0   :  { %v126_v27 = vpop.f32.mrf.mxu1 }
  0xa1   :  { %v113_v26 = vpop.f32.mrf.mxu0 }
  0xa6   :  { %v137_v30 = vpop.f32.mrf.mxu2 }
  0xae   :  { %v139_v35 = vpop.f32.mrf.mxu2 }
  0xb3   :  { %v323_v33 = vpop.f32.mrf.mxu0 }
  0xb4   :  { %v310_v36 = vpop.f32.mrf.mxu3  ;;  %v345_v41 = vadd.f32 %v323_v33, %v124_v23 }
  0xb5   :  { %v340_v38 = vadd.f32 %v310_v36, %v111_v22 }
  0xb6   :  { %v336_v37 = vpop.f32.mrf.mxu1  ;;  %v346_v44 = vmul.f32 0.5, %v345_v41 }
  0xb7   :  { %v341_v39 = vmul.f32 0.5, %v340_v38 }
  0xb9   :  { %649 = vtanh.f32 %v341_v39 }
  0xba   :  { %651 = vtanh.f32 %v346_v44 }
  0xbb   :  { %v325_v40 = vpop.f32.mrf.mxu0 }
  0xbc   :  { %v312_v42 = vpop.f32.mrf.mxu3 }
  0xbe   :  { %v338_v43 = vpop.f32.mrf.mxu1 }
  0xbf   :  { %v650_v45 = vpop.eup %649 }
  0xc0   :  { %v343_v46 = vmul.f32 0.5, %v650_v45  ;;  %v652_v50 = vpop.eup %651 }
  0xc1   :  { %v348_v51 = vmul.f32 0.5, %v652_v50 }
  0xc2   :  { %v344_v47 = vadd.f32 0.5, %v343_v46 }
  0xc3   :  { %v349_v53 = vadd.f32 0.5, %v348_v51 }
  0xc4   :  { %v350_v48 = vmul.f32 %v344_v47, %v336_v37 }
  0xc6   :  { %v351_v49 = vadd.f32 %v350_v48, %v137_v30 }
  0xc8   :  { %653 = vtanh.f32 %v351_v49 }
  0xce   :  { %v654_v52 = vpop.eup %653 }
  0xcf   :  { %v353_v54 = vsub.f32 %v76_v14, %v654_v52 }
  0xd1   :  { %v354_v55 = vmul.f32 %v353_v54, %v349_v53 }
  0xd3   :  { %v355_v56 = vadd.f32 %v654_v52, %v354_v55 }
  0xd5   :  { %356 = vst [vmem:[%s839_s7] sm:$0x3] %v355_v56  ;;  %v357_v57 = vpack.c.bf16 %v355_v56, %v355_v56 }
  0xd7   :  { %434 = vmatmul.bf16.vlgmr.msrb.gmra.mxu2 %v357_v57 }
 0x15a   :  { %v435_v59 = vpop.f32.mrf.mxu2 }
 0x15b   :  { %v436_v60 = vadd.f32 %v648_v58, %v435_v59 }
 0x15d   :  { %439 = vst [vmem:[#allocation8] sm:$0x3] %v436_v60 }
 0x15e   :  { %450 = dma.vmem_to_hbm [thread:$0]  %s446_s24, 32, %s448_s27, [#allocation4]  }
 0x162   :  { %v437_v61 = vpop.f32.mrf.mxu2 }
 0x163   :  { %755 = dma.done.wait [#allocation4], 32  }
 0x164   :  { %756 = vsyncadd [#allocation4], 4294967264 }
 0x165   :  { %459 = vsyncpa [#allocation3], 1 }
 0x166   :  { %460 = vsyncpa [#allocation6], 1 }
 0x167   :  { %461 = vsyncpa [#allocation4], 1 }

</bundles_post_ra>
